<compile_context>
chip_gen: v6e
topology: v6e:2x2x1
jax: 0.10.0
libtpu: 0.0.40
codegen_flags: <defaults>
</compile_context>

<pallas_src>
from functools import partial

import jax
import jax.numpy as jnp
from jax.experimental import pallas as pl
from jax.experimental.pallas import tpu as pltpu

BN_EPS = 1e-5


# ----------------------------------------------------------------------------
# Fused kernel.  Per image (one grid step):
#   y1  = relu(w1s @ x + sh1)                            (1x1 conv, BN folded)
#   y2  = relu(w2_mat @ im2col(zero_pad(y1)) + sh2)      (kxk conv, BN folded)
#   out = y1 + y2
# All tensors are (C, H*W) slabs: channels on sublanes, flat spatial on lanes.
# ----------------------------------------------------------------------------
def _mlp_block_kernel(x_ref, w1_ref, sh1_ref, w2_ref, sh2_ref, m_ref, o_ref,
                      *, H, W, k):
    HW = H * W
    p = (k - 1) // 2

    x = x_ref[0]                                     # (Cin, HW)

    # --- 1x1 conv + BN(folded) + ReLU -> y1 : (Cout, HW), lane-dense --------
    y1 = jnp.dot(w1_ref[...], x, preferred_element_type=jnp.float32)
    y1 = jnp.maximum(y1 + sh1_ref[...], 0.0)

    # --- im2col patch: k*k shifted, zero-masked views of y1 -----------------
    # Tap (ky, kx) is a shift of d = (ky-p)*W + (kx-p) in the flat spatial
    # index; pltpu.roll brings the neighbour into place (XLU) and the
    # precomputed 0/1 mask zeroes positions that fall into the 'same'
    # zero-padding of y1.  Pieces are concatenated along the contraction
    # (sublane) dim -> (k*k*Cout, HW).
    pieces = []
    for t in range(k * k):
        ky, kx = divmod(t, k)
        d = (ky - p) * W + (kx - p)
        if d == 0:
            pieces.append(y1)                        # centre tap: no shift/mask
        else:
            v = pltpu.roll(y1, (-d) % HW, 1)         # v[:, f] = y1[:, (f+d)%HW]
            pieces.append(v * m_ref[pl.ds(t, 1), :])
    patch = jnp.concatenate(pieces, axis=0)          # (k*k*Cout, HW)

    # --- kxk conv as ONE wide-K matmul + BN(folded) + ReLU + residual -------
    y2 = jnp.dot(w2_ref[...], patch, preferred_element_type=jnp.float32)
    y2 = jnp.maximum(y2 + sh2_ref[...], 0.0)
    o_ref[0] = (y1 + y2).astype(o_ref.dtype)


def fused_mlp_block(x_flat, w1s, sh1, w2_mat, sh2, masks, *, H, W, k):
    N, Cin, HW = x_flat.shape
    Cout = w1s.shape[0]
    kern = partial(_mlp_block_kernel, H=H, W=W, k=k)
    return pl.pallas_call(
        kern,
        out_shape=jax.ShapeDtypeStruct((N, Cout, HW), jnp.float32),
        grid=(N,),
        in_specs=[
            pl.BlockSpec((1, Cin, HW), lambda n: (n, 0, 0)),        # x slab
            pl.BlockSpec((Cout, Cin), lambda n: (0, 0)),            # w1 (scaled)
            pl.BlockSpec((Cout, 1), lambda n: (0, 0)),              # shift1
            pl.BlockSpec((Cout, k * k * Cout), lambda n: (0, 0)),   # w2 (im2col)
            pl.BlockSpec((Cout, 1), lambda n: (0, 0)),              # shift2
            pl.BlockSpec((k * k, HW), lambda n: (0, 0)),            # pad masks
        ],
        out_specs=pl.BlockSpec((1, Cout, HW), lambda n: (n, 0, 0)),
        compiler_params=pltpu.CompilerParams(
            dimension_semantics=("parallel",)),
    )(x_flat, w1s, sh1, w2_mat, sh2, masks)


# ----------------------------------------------------------------------------
# Host-side parameter prep: BN folding, im2col weight packing, pad masks.
# ----------------------------------------------------------------------------
def _fold_bn(bias, gamma, beta, mean, var):
    scale = gamma / jnp.sqrt(var + BN_EPS)
    shift = beta + scale * (bias - mean)
    return scale, shift


def _tap_masks(H, W, k):
    """(k*k, H*W) float 0/1 masks: 1 where tap (ky,kx) reads inside the image."""
    p = (k - 1) // 2
    h = jnp.arange(H)[:, None]
    w = jnp.arange(W)[None, :]
    ms = []
    for t in range(k * k):
        ky, kx = divmod(t, k)
        dy, dx = ky - p, kx - p
        valid = (h + dy >= 0) & (h + dy < H) & (w + dx >= 0) & (w + dx < W)
        ms.append(valid.reshape(-1))
    return jnp.stack(ms).astype(jnp.float32)


def init_params(key, nin, nout, kernel_size):
    ks = jax.random.split(key, 12)
    return {
        # conv1: 1x1
        "w1": jax.random.normal(ks[0], (nout, nin, 1, 1), jnp.float32) * 0.2,
        "b1": jax.random.normal(ks[1], (nout,), jnp.float32) * 0.1,
        "g1": 1.0 + 0.1 * jax.random.normal(ks[2], (nout,), jnp.float32),
        "beta1": 0.1 * jax.random.normal(ks[3], (nout,), jnp.float32),
        "m1": 0.05 * jax.random.normal(ks[4], (nout,), jnp.float32),
        "v1": jax.random.uniform(ks[5], (nout,), jnp.float32, 0.5, 1.5),
        # conv2: kxk, 'same' padding
        "w2": jax.random.normal(ks[6], (nout, nout, kernel_size, kernel_size),
                                jnp.float32) * 0.1,
        "b2": jax.random.normal(ks[7], (nout,), jnp.float32) * 0.1,
        "g2": 1.0 + 0.1 * jax.random.normal(ks[8], (nout,), jnp.float32),
        "beta2": 0.1 * jax.random.normal(ks[9], (nout,), jnp.float32),
        "m2": 0.05 * jax.random.normal(ks[10], (nout,), jnp.float32),
        "v2": jax.random.uniform(ks[11], (nout,), jnp.float32, 0.5, 1.5),
    }


def mlp_block_forward(x_nchw, params, *, kernel_size):
    assert kernel_size % 2 == 1, "only odd kernel_size matches torch 'same' pad"
    N, Cin, H, W = x_nchw.shape
    Cout = params["w1"].shape[0]
    k = kernel_size

    # Fold eval-mode BN: scale into the conv weights, shift stays a vector.
    s1, sh1 = _fold_bn(params["b1"], params["g1"], params["beta1"],
                       params["m1"], params["v1"])
    s2, sh2 = _fold_bn(params["b2"], params["g2"], params["beta2"],
                       params["m2"], params["v2"])

    w1s = params["w1"][:, :, 0, 0] * s1[:, None]                  # (Cout, Cin)
    w2s = params["w2"] * s2[:, None, None, None]                  # (Cout, Cout, k, k)
    # w2_mat[co, t*Cout + ci] = w2s[co, ci, ky, kx]  with t = ky*k + kx,
    # matching the order in which the kernel stacks the tap views.
    w2_mat = jnp.transpose(w2s, (0, 2, 3, 1)).reshape(Cout, k * k * Cout)

    masks = _tap_masks(H, W, k)

    # NCHW kept; flattening (H, W) -> H*W is a contiguous reshape (no HBM
    # transpose / pad round trips in the wrapper).
    x_flat = x_nchw.reshape(N, Cin, H * W)
    out = fused_mlp_block(x_flat, w1s, sh1.reshape(Cout, 1), w2_mat,
                          sh2.reshape(Cout, 1), masks, H=H, W=W, k=k)
    return out.reshape(N, Cout, H, W)


# ----------------------------------------------------------------------------
# Pure-JAX reference (mirrors the PyTorch forward, eval-mode BN)
# ----------------------------------------------------------------------------
def ref_forward(x_nchw, params, *, kernel_size):
    def cbr(x, w, b, g, beta, m, v, pad):
        y = jax.lax.conv_general_dilated(
            x, w, (1, 1), [(pad, pad), (pad, pad)],
            dimension_numbers=("NCHW", "OIHW", "NCHW"))
        y = y + b[None, :, None, None]
        y = g[None, :, None, None] * (y - m[None, :, None, None]) / \
            jnp.sqrt(v[None, :, None, None] + BN_EPS) + beta[None, :, None, None]
        return jnp.maximum(y, 0.0)

    y1 = cbr(x_nchw, params["w1"], params["b1"], params["g1"],
             params["beta1"], params["m1"], params["v1"], 0)
    y2 = cbr(y1, params["w2"], params["b2"], params["g2"],
             params["beta2"], params["m2"], params["v2"], (kernel_size - 1) // 2)
    return y1 + y2


if __name__ == "__main__":
    nin, nout, kernel_size = 4, 8, 3
    N, H, W = 2, 16, 16

    key = jax.random.PRNGKey(0)
    kx_, kp_ = jax.random.split(key)
    x = jax.random.normal(kx_, (N, nin, H, W), jnp.float32)   # NCHW like PyTorch
    params = init_params(kp_, nin, nout, kernel_size)

    out = mlp_block_forward(x, params, kernel_size=kernel_size)
    out = jax.block_until_ready(out)

    ref = ref_forward(x, params, kernel_size=kernel_size)
    assert out.shape == (N, nout, H, W)
    assert jnp.allclose(out, ref, rtol=2e-3, atol=2e-3), \
        float(jnp.max(jnp.abs(out - ref)))

    print("KERNEL_OK")
</pallas_src>

<mosaic_0001>
module attributes {stable_mosaic.version = 11 : i64} {
  func.func @_mlp_block_kernel(%arg0: i32, %arg1: memref<1x4x256xf32, #tpu.memory_space<vmem>>, %arg2: memref<8x4xf32, #tpu.memory_space<vmem>>, %arg3: memref<8x1xf32, #tpu.memory_space<vmem>>, %arg4: memref<8x72xf32, #tpu.memory_space<vmem>>, %arg5: memref<8x1xf32, #tpu.memory_space<vmem>>, %arg6: memref<9x256xf32, #tpu.memory_space<vmem>>, %arg7: memref<1x8x256xf32, #tpu.memory_space<vmem>>) attributes {dimension_semantics = [#tpu.dimension_semantics<parallel>], iteration_bounds = array<i64: 2>, scalar_prefetch = 0 : i64, scratch_operands = 0 : i64, tpu.core_type = #tpu.core_type<tc>, window_params = [{transform_indices = @transform_0, window_bounds = array<i64: 1, 4, 256>}, {pipeline_mode = #tpu.pipeline_mode<synchronous>, transform_indices = @transform_1, window_bounds = array<i64: 8, 4>}, {pipeline_mode = #tpu.pipeline_mode<synchronous>, transform_indices = @transform_2, window_bounds = array<i64: 8, 1>}, {pipeline_mode = #tpu.pipeline_mode<synchronous>, transform_indices = @transform_3, window_bounds = array<i64: 8, 72>}, {pipeline_mode = #tpu.pipeline_mode<synchronous>, transform_indices = @transform_4, window_bounds = array<i64: 8, 1>}, {pipeline_mode = #tpu.pipeline_mode<synchronous>, transform_indices = @transform_5, window_bounds = array<i64: 9, 256>}, {transform_indices = @transform_6, window_bounds = array<i64: 1, 8, 256>}]} {
    %c0 = arith.constant 0 : index
    %c0_0 = arith.constant 0 : index
    %c0_1 = arith.constant 0 : index
    %0 = vector.load %arg1[%c0, %c0_0, %c0_1] : memref<1x4x256xf32, #tpu.memory_space<vmem>>, vector<1x4x256xf32>
    %1 = vector.shape_cast %0 : vector<1x4x256xf32> to vector<4x256xf32>
    %c0_2 = arith.constant 0 : index
    %c0_3 = arith.constant 0 : index
    %2 = vector.load %arg2[%c0_2, %c0_3] : memref<8x4xf32, #tpu.memory_space<vmem>>, vector<8x4xf32>
    %cst = arith.constant dense<0.000000e+00> : vector<8x256xf32>
    %3 = tpu.matmul %2, %1, %cst {dimension_numbers = #tpu.dot_dimension_numbers<[1], [0], [0], [1], [0, 0, 1, 1], [], []>} : vector<8x4xf32>, vector<4x256xf32>, vector<8x256xf32> -> vector<8x256xf32>
    %c0_4 = arith.constant 0 : index
    %c0_5 = arith.constant 0 : index
    %4 = vector.load %arg3[%c0_4, %c0_5] : memref<8x1xf32, #tpu.memory_space<vmem>>, vector<8x1xf32>
    %5 = vector.broadcast %4 : vector<8x1xf32> to vector<8x256xf32>
    %6 = arith.addf %3, %5 : vector<8x256xf32>
    %cst_6 = arith.constant 0.000000e+00 : f32
    %7 = vector.broadcast %cst_6 : f32 to vector<8x256xf32>
    %8 = arith.maximumf %6, %7 : vector<8x256xf32>
    %c17_i32 = arith.constant 17 : i32
    %9 = tpu.dynamic_rotate %8 by %c17_i32 dim 1 : vector<8x256xf32>, i32 -> vector<8x256xf32>
    %c0_7 = arith.constant 0 : index
    %c0_8 = arith.constant 0 : index
    %10 = vector.load %arg6[%c0_7, %c0_8] : memref<9x256xf32, #tpu.memory_space<vmem>>, vector<1x256xf32>
    %11 = vector.broadcast %10 : vector<1x256xf32> to vector<8x256xf32>
    %12 = arith.mulf %9, %11 : vector<8x256xf32>
    %c16_i32 = arith.constant 16 : i32
    %13 = tpu.dynamic_rotate %8 by %c16_i32 dim 1 : vector<8x256xf32>, i32 -> vector<8x256xf32>
    %c1 = arith.constant 1 : index
    %c0_9 = arith.constant 0 : index
    %14 = vector.load %arg6[%c1, %c0_9] : memref<9x256xf32, #tpu.memory_space<vmem>>, vector<1x256xf32>
    %15 = vector.broadcast %14 : vector<1x256xf32> to vector<8x256xf32>
    %16 = arith.mulf %13, %15 : vector<8x256xf32>
    %c15_i32 = arith.constant 15 : i32
    %17 = tpu.dynamic_rotate %8 by %c15_i32 dim 1 : vector<8x256xf32>, i32 -> vector<8x256xf32>
    %c2 = arith.constant 2 : index
    %c0_10 = arith.constant 0 : index
    %18 = vector.load %arg6[%c2, %c0_10] : memref<9x256xf32, #tpu.memory_space<vmem>>, vector<1x256xf32>
    %19 = vector.broadcast %18 : vector<1x256xf32> to vector<8x256xf32>
    %20 = arith.mulf %17, %19 : vector<8x256xf32>
    %c1_i32 = arith.constant 1 : i32
    %21 = tpu.dynamic_rotate %8 by %c1_i32 dim 1 : vector<8x256xf32>, i32 -> vector<8x256xf32>
    %c3 = arith.constant 3 : index
    %c0_11 = arith.constant 0 : index
    %22 = vector.load %arg6[%c3, %c0_11] : memref<9x256xf32, #tpu.memory_space<vmem>>, vector<1x256xf32>
    %23 = vector.broadcast %22 : vector<1x256xf32> to vector<8x256xf32>
    %24 = arith.mulf %21, %23 : vector<8x256xf32>
    %c255_i32 = arith.constant 255 : i32
    %25 = tpu.dynamic_rotate %8 by %c255_i32 dim 1 : vector<8x256xf32>, i32 -> vector<8x256xf32>
    %c5 = arith.constant 5 : index
    %c0_12 = arith.constant 0 : index
    %26 = vector.load %arg6[%c5, %c0_12] : memref<9x256xf32, #tpu.memory_space<vmem>>, vector<1x256xf32>
    %27 = vector.broadcast %26 : vector<1x256xf32> to vector<8x256xf32>
    %28 = arith.mulf %25, %27 : vector<8x256xf32>
    %c241_i32 = arith.constant 241 : i32
    %29 = tpu.dynamic_rotate %8 by %c241_i32 dim 1 : vector<8x256xf32>, i32 -> vector<8x256xf32>
    %c6 = arith.constant 6 : index
    %c0_13 = arith.constant 0 : index
    %30 = vector.load %arg6[%c6, %c0_13] : memref<9x256xf32, #tpu.memory_space<vmem>>, vector<1x256xf32>
    %31 = vector.broadcast %30 : vector<1x256xf32> to vector<8x256xf32>
    %32 = arith.mulf %29, %31 : vector<8x256xf32>
    %c240_i32 = arith.constant 240 : i32
    %33 = tpu.dynamic_rotate %8 by %c240_i32 dim 1 : vector<8x256xf32>, i32 -> vector<8x256xf32>
    %c7 = arith.constant 7 : index
    %c0_14 = arith.constant 0 : index
    %34 = vector.load %arg6[%c7, %c0_14] : memref<9x256xf32, #tpu.memory_space<vmem>>, vector<1x256xf32>
    %35 = vector.broadcast %34 : vector<1x256xf32> to vector<8x256xf32>
    %36 = arith.mulf %33, %35 : vector<8x256xf32>
    %c239_i32 = arith.constant 239 : i32
    %37 = tpu.dynamic_rotate %8 by %c239_i32 dim 1 : vector<8x256xf32>, i32 -> vector<8x256xf32>
    %c8 = arith.constant 8 : index
    %c0_15 = arith.constant 0 : index
    %38 = vector.load %arg6[%c8, %c0_15] : memref<9x256xf32, #tpu.memory_space<vmem>>, vector<1x256xf32>
    %39 = vector.broadcast %38 : vector<1x256xf32> to vector<8x256xf32>
    %40 = arith.mulf %37, %39 : vector<8x256xf32>
    %41 = tpu.concatenate %12, %16, %20, %24, %8, %28, %32, %36, %40 in 0 : vector<8x256xf32>, vector<8x256xf32>, vector<8x256xf32>, vector<8x256xf32>, vector<8x256xf32>, vector<8x256xf32>, vector<8x256xf32>, vector<8x256xf32>, vector<8x256xf32> -> vector<72x256xf32>
    %c0_16 = arith.constant 0 : index
    %c0_17 = arith.constant 0 : index
    %42 = vector.load %arg4[%c0_16, %c0_17] : memref<8x72xf32, #tpu.memory_space<vmem>>, vector<8x72xf32>
    %cst_18 = arith.constant dense<0.000000e+00> : vector<8x256xf32>
    %43 = tpu.matmul %42, %41, %cst_18 {dimension_numbers = #tpu.dot_dimension_numbers<[1], [0], [0], [1], [0, 0, 1, 1], [], []>} : vector<8x72xf32>, vector<72x256xf32>, vector<8x256xf32> -> vector<8x256xf32>
    %c0_19 = arith.constant 0 : index
    %c0_20 = arith.constant 0 : index
    %44 = vector.load %arg5[%c0_19, %c0_20] : memref<8x1xf32, #tpu.memory_space<vmem>>, vector<8x1xf32>
    %45 = vector.broadcast %44 : vector<8x1xf32> to vector<8x256xf32>
    %46 = arith.addf %43, %45 : vector<8x256xf32>
    %cst_21 = arith.constant 0.000000e+00 : f32
    %47 = vector.broadcast %cst_21 : f32 to vector<8x256xf32>
    %48 = arith.maximumf %46, %47 : vector<8x256xf32>
    %49 = arith.addf %8, %48 : vector<8x256xf32>
    %c0_22 = arith.constant 0 : index
    %c0_23 = arith.constant 0 : index
    %c0_24 = arith.constant 0 : index
    %50 = vector.load %arg7[%c0_22, %c0_23, %c0_24] : memref<1x8x256xf32, #tpu.memory_space<vmem>>, vector<1x8x256xf32>
    %51 = vector.shape_cast %50 : vector<1x8x256xf32> to vector<8x256xf32>
    %52 = vector.shape_cast %49 : vector<8x256xf32> to vector<1x8x256xf32>
    tpu.vector_store %arg7[%c0_22, %c0_23, %c0_24], %52 {strides = array<i32>} : memref<1x8x256xf32, #tpu.memory_space<vmem>>, vector<1x8x256xf32>,
    return
  }
  func.func @transform_0(%arg0: i32) -> (i32, i32, i32) {
    %c0_i32 = arith.constant 0 : i32
    %c0_i32_0 = arith.constant 0 : i32
    %c0_i32_1 = arith.constant 0 : i32
    return %arg0, %c0_i32, %c0_i32_0 : i32, i32, i32
  }
  func.func @transform_1(%arg0: i32) -> (i32, i32) {
    %c0_i32 = arith.constant 0 : i32
    %c0_i32_0 = arith.constant 0 : i32
    %c0_i32_1 = arith.constant 0 : i32
    return %c0_i32, %c0_i32_0 : i32, i32
  }
  func.func @transform_2(%arg0: i32) -> (i32, i32) {
    %c0_i32 = arith.constant 0 : i32
    %c0_i32_0 = arith.constant 0 : i32
    %c0_i32_1 = arith.constant 0 : i32
    return %c0_i32, %c0_i32_0 : i32, i32
  }
  func.func @transform_3(%arg0: i32) -> (i32, i32) {
    %c0_i32 = arith.constant 0 : i32
    %c0_i32_0 = arith.constant 0 : i32
    %c0_i32_1 = arith.constant 0 : i32
    return %c0_i32, %c0_i32_0 : i32, i32
  }
  func.func @transform_4(%arg0: i32) -> (i32, i32) {
    %c0_i32 = arith.constant 0 : i32
    %c0_i32_0 = arith.constant 0 : i32
    %c0_i32_1 = arith.constant 0 : i32
    return %c0_i32, %c0_i32_0 : i32, i32
  }
  func.func @transform_5(%arg0: i32) -> (i32, i32) {
    %c0_i32 = arith.constant 0 : i32
    %c0_i32_0 = arith.constant 0 : i32
    %c0_i32_1 = arith.constant 0 : i32
    return %c0_i32, %c0_i32_0 : i32, i32
  }
  func.func @transform_6(%arg0: i32) -> (i32, i32, i32) {
    %c0_i32 = arith.constant 0 : i32
    %c0_i32_0 = arith.constant 0 : i32
    %c0_i32_1 = arith.constant 0 : i32
    return %arg0, %c0_i32, %c0_i32_0 : i32, i32, i32
  }
}

</mosaic_0001>

<bundles_post_ra>
// kernel: tpu_custom_call.1
= control target key start
LH: loop header
LB: loop body
LE: loop exit
PB: predicated region body
PF: predicated region fallthrough
CT: control target
= control target key end

     0   :  { %s1274_s0 = inlined_call_operand.hbm [shape: f32[2,4,256], index: 0, kind: input, shape index: {}]   ;;  %s1275_s1 = inlined_call_operand.vmem [shape: f32[8,4], index: 1, kind: input, shape index: {}]   ;;  %s1276_s2 = inlined_call_operand.vmem [shape: f32[8,1], index: 2, kind: input, shape index: {}]   ;;  %s1277_s3 = inlined_call_operand.hbm [shape: f32[8,72], index: 3, kind: input, shape index: {}]   ;;  %s1278_s4 = inlined_call_operand.vmem [shape: f32[8,1], index: 4, kind: input, shape index: {}]   ;;  %s1279_s5 = inlined_call_operand.vmem [shape: f32[9,256], index: 5, kind: input, shape index: {}]   ;;  %s1280_s6 = inlined_call_operand.hbm [shape: f32[2,8,256], index: 6, kind: output, shape index: {}]  }
   0x1   :  { %1285 = sst [smem:[#allocation11_spill]] %s1277_s3 }
   0x2   :  { %11 = vsyncpa [#allocation3], 0 }
   0x3   :  { %13 = vsyncpa [#allocation3 + $0x1], 0 }
   0x4   :  { %14 = vsyncpa [#allocation6], 0 }
   0x5   :  { %15 = vsyncpa [#allocation4], 0 }
   0x6   :  { %17 = vsyncpa [#allocation4 + $0x1], 0  ;;  %s1004_s21 = smov 0   ;;  %s1006_s22 = smov 0  }
   0x7   :  { %s1008_s23 = smov 0   ;;  %s1010_s24 = smov 0  }
   0x8 LB: > { %s1025_s25 = sadd.s32 4294967295, %s954_s24   ;;  %s733_s26 = sadd.s32 4294967294, %s954_s24   ;;  %s954_s24 = sphi %s1010_s24, %s1305_s24   ;;  %s950_s23 = sphi %s1008_s23, %s1304_s23   ;;  %s946_s22 = sphi %s1006_s22, %s1303_s22   ;;  %s942_s21 = sphi %s1004_s21, %s1302_s21  }
   0x9   : > { %p43_p0 = scmp.ne.s32.totalorder %s946_s22, %s942_s21  ;;  %p1281_p1 = scmp.eq.s32.totalorder %s1025_s25, 0 }
   0xa   : > { %p178_p3 = scmp.eq.s32.totalorder %s733_s26, 1  ;;  %p734_p5 = scmp.ge.s32.totalorder %s954_s24, 1 }
   0xb   : > { %p1034_p4 = por %p1281_p1, %p43_p0  ;;  %p185_p7 = scmp.lt.s32.totalorder %s954_s24, 3 }
   0xc   : > { %p1039_p6 = por %p178_p3, %p43_p0  ;;  %s956_s30 = smov [#allocation5]  }
   0xd   : > { %s1286_s27 = scalar_select %p1034_p4, 1, 0 }
   0xe   : > { %s1287_s28 = scalar_select %p1039_p6, 1, 0 }
   0xf   : > { %p1044_p8 = pnand %p734_p5, %p185_p7  ;;  %s204_s7 = sshll.u32 %s956_s30, 4  ;;  %s205_s7 = int_to_ptr.vmem [resolvable:$true] %s204_s7 }
  0x10   : > { %s1052_s8 = sadd.s32 1, %s954_s24   ;;  %s30_s12 = sadd.s32 1, %s950_s23 }
  0x11   : > { %s1288_s29 = scalar_select %p1044_p8, 1, 0 }
  0x12   : > { %p770_p10 = pneg %p1044_p8  ;;  %s27_s10 = ssub.s32 %s954_s24, %s1052_s8 }
  0x13   : > { %p1062_p12 = scmp.eq.s32.totalorder %s27_s10, 0  ;;  %p37_p13 = scmp.ne.s32.totalorder %s950_s23, %s946_s22 }
  0x14   : > { %p1056_p11 = pnand %p770_p10, %p1281_p1  ;;  %s843_s13 = scalar_lea.vmem %s205_s7, 128 }
  0x15   : > { %p844_p3 = scmp.ne.s32.totalorder %s205_s7, %s843_s13  ;;  %p851_p9 = scmp.lt.s32.totalorder %s205_s7, %s205_s7 }
  0x16   : > { %p834_p0 = pneg %p1056_p11  ;;  %p852_p2 = scmp.lt.s32.totalorder %s843_s13, %s843_s13 }
  0x18   : > { %p846_p5 = pnand %p844_p3, %p834_p0  ;;  %p853_p10 = por %p852_p2, %p851_p9 }
  0x1a   : > { %p847_p7 = pneg %p846_p5 }
  0x1c   : > { %p854_p1 = pnand %p853_p10, %p847_p7 }
  0x1e   : > { %857 = shalt.err (!%p854_p1)
}
  0x1f   : > { %s1291_s3 = sld [smem:[#allocation11_spill]]  ;;  %p38_p1 = scmp.eq.s32.totalorder %s954_s24, 0 }
  0x20   : > { %s1079_s16 = scalar_select %p1062_p12, %s950_s23, %s30_s12  }
  0x21   : > { %p1292_p2 = scmp.eq.s32.totalorder %s1025_s25, 1  ;;  %p783_p0 = scmp.lt.s32.totalorder %s954_s24, 2 }
  0x22   : > { %s221_s18 = sand.u32 1, %s950_s23   ;;  %p39_p3 = por %p38_p1, %p37_p13 }
  0x23   : > { %p1087_p9 = por %p1292_p2, %p37_p13  ;;  %s737_s19 = sshll.u32 %s221_s18, 3 }
  0x24   : > { %s760_s20 = sshll.u32 %s954_s24, 7  ;;  %s225_s9 = scalar_lea.vmem [#allocation2], %s737_s19 }
  0x25   : > { %773 = dma.hbm_to_vmem [thread:$0]  (!%p1056_p11), %s1291_s3, 128, %s205_s7, [#allocation6]  }
  0x26   : > { %s1293_s17 = scalar_select %p1087_p9, 1, 0 }
  0x27   : > { %s1100_s7 = scalar_lea.hbm %s1274_s0, %s760_s20  ;;  %s233_s10 = sshll.u32 %s225_s9, 4  ;;  %s234_s10 = int_to_ptr.vmem [resolvable:$true] %s233_s10 }
  0x28   : > { %p1102_p11 = pnand %p783_p0, %p39_p3  ;;  %s222_s12 = scalar_lea.sflag [#allocation3], %s221_s18 }
  0x29   : > { %s858_s13 = scalar_lea.hbm %s1100_s7, 128  ;;  %s863_s20 = scalar_lea.hbm %s1274_s0, 256 }
  0x2a   : > { %p859_p12 = scmp.ne.s32.totalorder %s1100_s7, %s858_s13  ;;  %p860_p13 = pneg %p1102_p11 }
  0x2b   : > { %p864_p10 = scmp.lt.s32.totalorder %s1100_s7, %s1274_s0  ;;  %p865_p1 = scmp.lt.s32.totalorder %s863_s20, %s858_s13 }
  0x2c   : > { %p861_p5 = pnand %p860_p13, %p859_p12 }
  0x2d   : > { %p866_p2 = por %p865_p1, %p864_p10 }
  0x2e   : > { %p862_p7 = pneg %p861_p5 }
  0x30   : > { %p867_p0 = pnand %p866_p2, %p862_p7 }
  0x32   : > { %870 = shalt.err (!%p867_p0)
}
  0x33   : > { %s871_s30 = scalar_lea.vmem %s234_s10, 128  ;;  %s957_s18 = smov [#allocation2]  }
  0x34   : > { %p872_p3 = scmp.ne.s32.totalorder %s234_s10, %s871_s30  ;;  %s876_s9 = sshll.u32 %s957_s18, 4  ;;  %s877_s9 = int_to_ptr.vmem [resolvable:$false] %s876_s9 }
  0x35   : > { %s878_s3 = scalar_lea.vmem %s877_s9, 256  ;;  %p879_p12 = scmp.lt.s32.totalorder %s234_s10, %s877_s9 }
  0x36   : > { %p874_p6 = pnand %p872_p3, %p860_p13  ;;  %p880_p5 = scmp.lt.s32.totalorder %s878_s3, %s871_s30 }
  0x38   : > { %p875_p9 = pneg %p874_p6  ;;  %p881_p4 = por %p880_p5, %p879_p12 }
  0x3a   : > { %p882_p8 = pnand %p881_p4, %p875_p9 }
  0x3c   : > { %885 = shalt.err (!%p882_p8)
}
  0x3d   : > { %777 = dma.hbm_to_vmem [thread:$0]  (!%p1102_p11), %s1100_s7, 128, %s234_s10, %s222_s12  }
  0x3e   : > { %p1295_p7 = scmp.ne.s32.totalorder %s1288_s29, 0 }
  0x3f   : > { %s1123_s13 = sand.u32 (!%p1295_p7), 1, %s946_s22   ;;  %p1296_p6 = scmp.ne.s32.totalorder (!%p1295_p7), %s1286_s27, 0 }
  0x40   : > { %242 = sbr.rel (%p1295_p7) target bundleno = 637 (0x27d), region = 44  ;;  %s741_s14 = sshll.u32 (!%p1295_p7), %s1123_s13, 3 }
  0x41   : > { %s245_s15 = scalar_lea.sflag (!%p1295_p7), [#allocation3], %s1123_s13  ;;  %s248_s20 = scalar_lea.vmem (!%p1295_p7), [#allocation2], %s741_s14 }
  0x45   : > { %929 = dma.done.wait (%p1296_p6), %s245_s15, 128  }
  0x46   : > { %931 = vsyncadd (%p1296_p6), %s245_s15, 4294967168  ;;  %p1297_p4 = scmp.eq.s32.totalorder %s1025_s25, 0 }
  0x48   : > { %933 = dma.done.wait (%p1297_p4), [#allocation6], 128   ;;  %p1298_p8 = pmov %p1297_p4 }
  0x49   : > { %v958_v0 = vmov 0.0   ;;  %v959_v1 = vmov 0   ;;  %v281_v2 = vld [vmem:[%s248_s20] sm:$0xff]  ;;  %vm295_vm0 = vcmask 1043456   ;;  %vm291_vm1 = vcmask 31744   ;;  %s960_s10 = smov 112  }
  0x4a   : > { %935 = vsyncadd (%p1298_p8), [#allocation6], 4294967168  ;;  %364 = vmatprep.mubr.f32.mxu0 %v958_v0  ;;  %829 = vset.pattern.permute.xlu0 %v959_v1  ;;  %v283_v3 = vld [vmem:[%s1276_s2] sm:$0xff]  ;;  %v290_v4 = vcombine.high %v281_v2, %v281_v2  ;;  %s961_s11 = smov 111   ;;  %s962_s12 = smov 113   ;;  %v377_v16 = vlaneseq  ;;  %vm557_vm10 = vcmask 588800  }
  0x4b   : > { %625 = vmatprep.mubr.f32.mxu1 %v958_v0  ;;  %830 = vset.pattern.permute.xlu1 %v959_v1  ;;  %v282_v5 = vld [vmem:[%s1275_s1] sm:$0xff]  ;;  %s963_s26 = smov 127   ;;  %s964_s19 = smov 1   ;;  %v753_v21 = vld [vmem:[%s1279_s5 + $0x10] ss:$8 sm:$0x3] }
  0x4c   : > { %286 = vperm.xlu0 %829, %v283_v3   ;;  %744 = vmatprep.subr.msk.mxu0 %vm295_vm0, %v290_v4  ;;  %s965_s30 = smov 15   ;;  %s966_s18 = smov 16   ;;  %v551_v13 = vld [vmem:[%s1278_s4] sm:$0xff]  ;;  %v385_v18 = vshrl.u32 %v377_v16, 7  ;;  %v1164_v20 = vand.u32 127, %v377_v16 }
  0x4d   : > { %745 = vmatpush1.msk.msra.mxu0 %vm295_vm0, %v281_v2  ;;  %s967_s9 = smov 17   ;;  %v752_v26 = vld [vmem:[%s1279_s5 + $0x7] ss:$8 sm:$0x3]  ;;  %s743_s3 = sshll.u32 %s1123_s13, 4 }
  0x4e   : > { %746 = vmatmul.mubr.msk.f32.vlgmr.msra.gmra.mxu0 %vm291_vm1, %v282_v5  ;;  %v1169_v22 = vsub.s32 0, %v385_v18  ;;  %v1171_v23 = vsub.s32 1, %v385_v18  ;;  %vm510_vm2 = vcmp.lt.s32.totalorder %v1164_v20, 112  ;;  %v751_v27 = vld [vmem:[%s1279_s5 + $0x6] ss:$8 sm:$0x3] }
  0x4f   : > { %vm532_vm3 = vcmp.lt.s32.totalorder %v1164_v20, 111  ;;  %vm488_vm4 = vcmp.lt.s32.totalorder %v1164_v20, 113  ;;  %v750_v37 = vld [vmem:[%s1279_s5 + $0x5] ss:$8 sm:$0x3]  ;;  %vm466_vm5 = vcmp.lt.s32.totalorder %v1164_v20, 127 }
  0x50   : > { %v545_v28 = vrot.slane %v753_v21, %v1171_v23  ;;  %v541_v29 = vrot.slane %v753_v21, %v1169_v22  ;;  %v519_v30 = vrot.slane %v752_v26, %v1169_v22  ;;  %v523_v31 = vrot.slane %v752_v26, %v1171_v23  ;;  %v749_v52 = vld [vmem:[%s1279_s5 + $0x3] ss:$8 sm:$0x3]  ;;  %v748_v56 = vld [vmem:[%s1279_s5 + $0x2] ss:$8 sm:$0x3] }
  0x51   : > { %v501_v35 = vrot.slane %v751_v27, %v1171_v23  ;;  %v497_v42 = vrot.slane %v751_v27, %v1169_v22  ;;  %v479_v46 = vrot.slane %v750_v37, %v1171_v23  ;;  %v475_v50 = vrot.slane %v750_v37, %v1169_v22  ;;  %v747_v0 = vld [vmem:[%s1279_s5 + $0x1] ss:$8 sm:$0x3]  ;;  %v382_v5 = vld [vmem:[%s1279_s5] ss:$8 sm:$0x3] }
  0x52   : > { %vm444_vm6 = vcmp.lt.s32.totalorder %v1164_v20, 1  ;;  %v457_v58 = vrot.slane %v749_v52, %v1171_v23  ;;  %vm422_vm7 = vcmp.lt.s32.totalorder %v1164_v20, 15  ;;  %v453_v62 = vrot.slane %v749_v52, %v1169_v22  ;;  %s761_s29 = sshll.u32 %s1025_s25, 8  ;;  %s280_s27 = scalar_lea.vmem [#allocation7], %s743_s3 }
  0x53   : > { %v435_v2 = vrot.slane %v748_v56, %v1171_v23  ;;  %vm400_vm8 = vcmp.lt.s32.totalorder %v1164_v20, 16  ;;  %v431_v3 = vrot.slane %v748_v56, %v1169_v22  ;;  %vm379_vm9 = vcmp.lt.s32.totalorder %v1164_v20, 17  ;;  %s653_s7 = sshll.u32 %s280_s27, 4  ;;  %p1299_p11 = scmp.ne.s32.totalorder %s1293_s17, 0  ;;  %s654_s7 = int_to_ptr.vmem [resolvable:$true] %s653_s7 }
  0x54   : > { %v387_v18 = vrot.slane %v382_v5, %v1169_v22  ;;  %s968_s25 = smov [#allocation7]  }
  0xc7   : > { %v287_v6 = vpop.permute.xlu0 %286 }
 0x10e   : > { %v366_v7 = vpop.f32.mrf.mxu0 }
 0x10f   : > { %v367_v8 = vadd.f32 %v366_v7, %v287_v6 }
 0x110   : > { %v368_v9 = vpop.f32.mrf.mxu0 }
 0x111   : > { %v1141_v10 = vmax.f32 %v367_v8, 0.0  ;;  %v369_v11 = vadd.f32 %v368_v9, %v287_v6  ;;  %v413_v9 = vrot.slane %v747_v0, %v1171_v23 }
 0x113   : > { %506 = vrot.lane.b32.xlu1 %v1141_v10, %s960_s10  ;;  %528 = vrot.lane.b32.xlu0 %v1141_v10, %s961_s11  ;;  %v1145_v12 = vmax.f32 %v369_v11, 0.0 }
 0x117   : > { %484 = vrot.lane.b32.xlu1 %v1141_v10, %s962_s12  ;;  %508 = vrot.lane.b32.xlu0 %v1145_v12, %s960_s10 }
 0x11b   : > { %462 = vrot.lane.b32.xlu1 %v1141_v10, %s963_s26  ;;  %486 = vrot.lane.b32.xlu0 %v1145_v12, %s962_s12  ;;  %s651_s12 = scalar_lea.hbm %s1280_s6, %s761_s29 }
 0x11f   : > { %530 = vrot.lane.b32.xlu1 %v1145_v12, %s961_s11  ;;  %464 = vrot.lane.b32.xlu0 %v1145_v12, %s963_s26  ;;  %s639_s26 = scalar_lea.sflag [#allocation4], %s1123_s13 }
 0x123   : > { %440 = vrot.lane.b32.xlu1 %v1141_v10, %s964_s19  ;;  %442 = vrot.lane.b32.xlu0 %v1145_v12, %s964_s19  ;;  %s886_s19 = scalar_lea.vmem %s654_s7, 256 }
 0x124   : > { %p887_p9 = scmp.ne.s32.totalorder %s654_s7, %s886_s19 }
 0x126   : > { %p888_p13 = pnand %p887_p9, %p1299_p11 }
 0x127   : > { %418 = vrot.lane.b32.xlu1 %v1141_v10, %s965_s30  ;;  %420 = vrot.lane.b32.xlu0 %v1145_v12, %s965_s30  ;;  %s890_s30 = sshll.u32 %s968_s25, 4  ;;  %s891_s30 = int_to_ptr.vmem [resolvable:$false] %s890_s30 }
 0x128   : > { %p889_p10 = pneg %p888_p13  ;;  %p893_p1 = scmp.lt.s32.totalorder %s654_s7, %s891_s30 }
 0x12b   : > { %396 = vrot.lane.b32.xlu1 %v1141_v10, %s966_s18  ;;  %398 = vrot.lane.b32.xlu0 %v1145_v12, %s966_s18  ;;  %s892_s18 = scalar_lea.vmem %s891_s30, 512 }
 0x12c   : > { %p894_p2 = scmp.lt.s32.totalorder %s892_s18, %s886_s19 }
 0x12e   : > { %p895_p0 = por %p894_p2, %p893_p1 }
 0x12f   : > { %373 = vrot.lane.b32.xlu1 %v1141_v10, %s967_s9  ;;  %375 = vrot.lane.b32.xlu0 %v1145_v12, %s967_s9 }
 0x130   : > { %p896_p3 = pnand %p895_p0, %p889_p10 }
 0x133   : > { %554 = vperm.xlu1 %830, %v551_v13  }
 0x185   : > { %v507_v14 = vpop.permute.xlu1 %506  ;;  %v529_v15 = vpop.permute.xlu0 %528 }
 0x189   : > { %v485_v17 = vpop.permute.xlu1 %484  ;;  %v509_v19 = vpop.permute.xlu0 %508 }
 0x18a   : > { %v512_v34 = vsel %vm510_vm2, %v509_v19, %v507_v14  ;;  %v511_v39 = vsel %vm510_vm2, %v507_v14, %v509_v19  ;;  %v409_v14 = vrot.slane %v747_v0, %v1169_v22  ;;  %v391_v19 = vrot.slane %v382_v5, %v1171_v23 }
 0x18b   : > { %v527_v44 = vmul.f32 %v523_v31, %v512_v34  ;;  %v526_v49 = vmul.f32 %v519_v30, %v511_v39  ;;  %v550_v31 = vld [vmem:[#allocation5] sm:$0xff] }
 0x18d   : > { %v463_v24 = vpop.permute.xlu1 %462  ;;  %v487_v25 = vpop.permute.xlu0 %486 }
 0x18e   : > { %v490_v43 = vsel %vm488_vm4, %v487_v25, %v485_v17  ;;  %v489_v45 = vsel %vm488_vm4, %v485_v17, %v487_v25 }
 0x18f   : > { %v505_v53 = vmul.f32 %v501_v35, %v490_v43  ;;  %v504_v55 = vmul.f32 %v497_v42, %v489_v45 }
 0x191   : > { %v531_v32 = vpop.permute.xlu1 %530  ;;  %v465_v33 = vpop.permute.xlu0 %464 }
 0x192   : > { %v533_v36 = vsel %vm532_vm3, %v529_v15, %v531_v32  ;;  %v534_v38 = vsel %vm532_vm3, %v531_v32, %v529_v15  ;;  %v468_v51 = vsel %vm466_vm5, %v465_v33, %v463_v24  ;;  %v467_v54 = vsel %vm466_vm5, %v463_v24, %v465_v33 }
 0x193   : > { %v549_v40 = vmul.f32 %v545_v28, %v534_v38  ;;  %v548_v41 = vmul.f32 %v541_v29, %v533_v36  ;;  %v483_v57 = vmul.f32 %v479_v46, %v468_v51  ;;  %v482_v61 = vmul.f32 %v475_v50, %v467_v54 }
 0x195   : > { %v441_v47 = vpop.permute.xlu1 %440  ;;  %575 = vmatprep.subr.mxu1 %v549_v40  ;;  %v443_v48 = vpop.permute.xlu0 %442 }
 0x196   : > { %576 = vmatpush1.msra.mxu1 %v548_v41  ;;  %v445_v63 = vsel %vm444_vm6, %v441_v47, %v443_v48  ;;  %v446_v1 = vsel %vm444_vm6, %v443_v48, %v441_v47 }
 0x197   : > { %577 = vmatprep.subr.mxu1 %v527_v44  ;;  %v461_v6 = vmul.f32 %v457_v58, %v445_v63  ;;  %v460_v13 = vmul.f32 %v453_v62, %v446_v1 }
 0x198   : > { %578 = vmatpush1.msra.mxu1 %v526_v49 }
 0x199   : > { %v419_v59 = vpop.permute.xlu1 %418  ;;  %579 = vmatprep.subr.mxu1 %v505_v53  ;;  %v421_v60 = vpop.permute.xlu0 %420 }
 0x19a   : > { %580 = vmatpush1.msra.mxu1 %v504_v55  ;;  %v423_v4 = vsel %vm422_vm7, %v419_v59, %v421_v60  ;;  %v424_v7 = vsel %vm422_vm7, %v421_v60, %v419_v59 }
 0x19b   : > { %581 = vmatprep.subr.mxu1 %v483_v57  ;;  %v439_v16 = vmul.f32 %v435_v2, %v423_v4  ;;  %v438_v21 = vmul.f32 %v431_v3, %v424_v7 }
 0x19c   : > { %582 = vmatpush1.msra.mxu1 %v482_v61 }
 0x19d   : > { %v397_v8 = vpop.permute.xlu1 %396  ;;  %583 = vmatprep.subr.mxu1 %v1145_v12  ;;  %v399_v11 = vpop.permute.xlu0 %398 }
 0x19e   : > { %v401_v15 = vsel %vm400_vm8, %v397_v8, %v399_v11  ;;  %584 = vmatpush1.msra.mxu1 %v1141_v10  ;;  %v402_v17 = vsel %vm400_vm8, %v399_v11, %v397_v8 }
 0x19f   : > { %585 = vmatprep.subr.mxu1 %v461_v6  ;;  %v417_v24 = vmul.f32 %v413_v9, %v401_v15  ;;  %v416_v27 = vmul.f32 %v409_v14, %v402_v17 }
 0x1a0   : > { %586 = vmatpush1.msra.mxu1 %v460_v13 }
 0x1a1   : > { %v374_v25 = vpop.permute.xlu1 %373  ;;  %587 = vmatprep.subr.mxu1 %v439_v16  ;;  %v376_v26 = vpop.permute.xlu0 %375 }
 0x1a2   : > { %v380_v28 = vsel %vm379_vm9, %v374_v25, %v376_v26  ;;  %v381_v29 = vsel %vm379_vm9, %v376_v26, %v374_v25  ;;  %588 = vmatpush1.msra.mxu1 %v438_v21 }
 0x1a3   : > { %v394_v30 = vmul.f32 %v387_v18, %v381_v29  ;;  %v395_v20 = vmul.f32 %v391_v19, %v380_v28  ;;  %589 = vmatprep.subr.mxu1 %v417_v24 }
 0x1a4   : > { %590 = vmatpush1.msra.mxu1 %v416_v27 }
 0x1a5   : > { %591 = vmatprep.subr.mxu1 %v395_v20 }
 0x1a6   : > { %592 = vmatpush1.msra.mxu1 %v394_v30 }
 0x1a7   : > { %754 = vmatmul.mubr.msk.f32.vlgmr.msra.gmra.mxu1 %vm557_vm10, %v550_v31 }
 0x1ae   : > { %v555_v22 = vpop.permute.xlu1 %554 }
 0x267   : > { %v627_v23 = vpop.f32.mrf.mxu1 }
 0x268   : > { %v628_v32 = vadd.f32 %v627_v23, %v555_v22 }
 0x269   : > { %v629_v33 = vpop.f32.mrf.mxu1 }
 0x26a   : > { %v632_v34 = vmax.f32 %v628_v32, 0.0  ;;  %v630_v35 = vadd.f32 %v629_v33, %v555_v22 }
 0x26c   : > { %v634_v36 = vadd.f32 %v632_v34, %v1141_v10  ;;  %v633_v37 = vmax.f32 %v630_v35, 0.0 }
 0x26e   : > { %636 = vst [vmem:[%s280_s27] sm:$0xff] %v634_v36  ;;  %v635_v38 = vadd.f32 %v633_v37, %v1145_v12 }
 0x270   : > { %637 = vst [vmem:[%s280_s27 + $0x8] sm:$0xff] %v635_v38 }
 0x271   : > { %899 = shalt.err (!%p896_p3)
}
 0x272   : > { %s900_s9 = scalar_lea.hbm %s651_s12, 256  ;;  %s904_s15 = scalar_lea.hbm %s1280_s6, 512 }
 0x273   : > { %p901_p12 = scmp.ne.s32.totalorder %s651_s12, %s900_s9  ;;  %p905_p6 = scmp.lt.s32.totalorder %s651_s12, %s1280_s6 }
 0x274   : > { %p906_p4 = scmp.lt.s32.totalorder %s904_s15, %s900_s9 }
 0x275   : > { %p902_p5 = pnand %p901_p12, %p1299_p11 }
 0x276   : > { %p907_p8 = por %p906_p4, %p905_p6 }
 0x277   : > { %p903_p7 = pneg %p902_p5 }
 0x279   : > { %p908_p9 = pnand %p907_p8, %p903_p7 }
 0x27b   : > { %911 = shalt.err (!%p908_p9)
}
 0x27c   : > { %768 = dma.vmem_to_hbm [thread:$0]  (%p1299_p11), %s654_s7, 256, %s651_s12, %s639_s26  }
 0x27d PF: > { %s665_s29 = sand.u32 1, %s942_s21   ;;  %p1300_p13 = scmp.ne.s32.totalorder %s1287_s28, 0 }
 0x27e   : > { %p1301_p10 = scmp.ge.s32.totalorder %s954_s24, 2  ;;  %s666_s27 = scalar_lea.sflag [#allocation4], %s665_s29 }
 0x280   : > { %p779_p1 = pnand %p1301_p10, %p1300_p13 }
 0x282   : > { %p780_p2 = pneg %p779_p1 }
 0x284   : > { %937 = dma.done.wait (%p780_p2), %s666_s27, 256  }
 0x285   : > { %939 = vsyncadd (%p780_p2), %s666_s27, 4294967040  ;;  %p20_p0 = scmp.ge.s32.totalorder %s1052_s8, 4   ;;  %s1302_s21 = smov %s946_s22 }
 0x286   : > { %s1303_s22 = smov %s950_s23  ;;  %s1304_s23 = smov %s1079_s16 }
 0x287   : > { %s1305_s24 = smov %s1052_s8  ;;  %22 = sbr.rel (!%p20_p0) target bundleno = 8 (0x8), region = 100 }
 0x28c   :  { %671 = vsyncpa [#allocation3], 1 }
 0x28d   :  { %673 = vsyncpa [#allocation3 + $0x1], 1 }
 0x28e   :  { %674 = vsyncpa [#allocation6], 1 }
 0x28f   :  { %675 = vsyncpa [#allocation4], 1 }
 0x290   :  { %677 = vsyncpa [#allocation4 + $0x1], 1 }

</bundles_post_ra>
